<compile_context>
chip_gen: v5e
topology: v5e:2x2
jax: 0.10.0
libtpu: 0.0.40
codegen_flags: <defaults>
</compile_context>

<pallas_src>
import functools

import jax
import jax.numpy as jnp
from jax.experimental import pallas as pl
from jax.experimental.pallas import tpu as pltpu

IN_FEATURES = 28 * 28   # 784
HIDDEN = 64
NUM_CLASSES = 10

HIDDEN_PAD = 128        # hidden aligned to lanes
CLASS_PAD = 128         # lane-dense output
NEG_BIG = -1e30         # padded-class bias -> excluded from softmax for free


def _round_up(x, m):
    return (x + m - 1) // m * m


def _choose_tile(batch, tb):
    """Batch tile: multiple of 8 sublanes, >=2 grid steps when batch allows (megacore)."""
    TB = min(tb, _round_up(batch, 8))
    if batch >= 16 and _round_up(batch, TB) // TB < 2:
        TB = _round_up((batch + 1) // 2, 8)
    return TB


def mnist_kernel(x_ref, w1_ref, b1_ref, w2_ref, b2_ref, o_ref):
    # x arrives f32 from HBM (no wrapper pre-pass); cast to bf16 in VMEM for the MXU.
    x = x_ref[...].astype(jnp.bfloat16)                        # (TB, 784)

    # ---- Linear(784 -> 64) + ReLU (hidden padded to 128; bf16 MXU, f32 accumulate) --
    h = jnp.dot(x, w1_ref[...], preferred_element_type=jnp.float32)
    h = jnp.maximum(h + b1_ref[...], 0.0)                      # bias broadcast (1,128)

    # TODO(synk): Dropout(p=0.1) is identity in eval mode; a training-mode variant
    # would build a Bernoulli mask with pltpu.prng_seed / pltpu.prng_random_bits.

    # ---- Linear(64 -> 10) (padded 128 -> 128) --------------------------------------
    logits = jnp.dot(h.astype(w2_ref.dtype), w2_ref[...],
                     preferred_element_type=jnp.float32)
    # Padded classes: W2 pad columns are zero, b2 pad is -1e30 -> logits ~ -1e30,
    # so exp() underflows to 0 and they never win the max.  No in-kernel mask needed.
    logits = logits + b2_ref[...]                              # bias broadcast (1,128)

    # ---- log_softmax over the lane-dense (padded) class axis -----------------------
    m = jnp.max(logits, axis=1, keepdims=True)                 # (TB, 1)
    z = logits - m
    lse = jnp.log(jnp.sum(jnp.exp(z), axis=1, keepdims=True))  # (TB, 1)
    o_ref[...] = (z - lse).astype(o_ref.dtype)                 # bf16 lane-dense store


def prepare_params(w1, b1, w2, b2):
    """One-time cast + lane-pad of the (tiny) weights/biases.  Call once, reuse.

    w1: (784, 64), b1: (64,), w2: (64, 10), b2: (10,)   (already x @ W layout).
    """
    w1p = jnp.pad(w1.astype(jnp.bfloat16),
                  ((0, 0), (0, HIDDEN_PAD - HIDDEN)))
    b1p = jnp.pad(b1.astype(jnp.float32).reshape(1, HIDDEN),
                  ((0, 0), (0, HIDDEN_PAD - HIDDEN)))
    w2p = jnp.pad(w2.astype(jnp.bfloat16),
                  ((0, HIDDEN_PAD - HIDDEN), (0, CLASS_PAD - NUM_CLASSES)))
    b2p = jnp.pad(b2.astype(jnp.float32).reshape(1, NUM_CLASSES),
                  ((0, 0), (0, CLASS_PAD - NUM_CLASSES)),
                  constant_values=NEG_BIG)
    return w1p, b1p, w2p, b2p


@functools.partial(jax.jit, static_argnames=("tb",))
def mnist_forward(x_nchw, w1p, b1p, w2p, b2p, *, tb=1024):
    """x_nchw: (B, 1, 28, 28) f32 -> log-probs (B, 10) f32.

    Params must come from prepare_params().  tb is the batch tile; 1024 keeps the
    double-buffered VMEM footprint ~7 MiB (safe on v5e/v6e/v7x defaults); sweep
    higher (2048-4096 with vmem_limit_bytes raised) on v7x if desired.
    """
    B = x_nchw.shape[0]

    # nn.Flatten(): a reshape of a contiguous array is free (no HBM copy, no cast).
    x2d = x_nchw.reshape(B, IN_FEATURES)

    TB = _choose_tile(B, tb)
    Bp = _round_up(B, TB)
    if Bp != B:  # only taken when B is not a multiple of the tile
        x2d = jnp.pad(x2d, ((0, Bp - B), (0, 0)))

    flops = 2 * Bp * IN_FEATURES * HIDDEN_PAD + 2 * Bp * HIDDEN_PAD * CLASS_PAD
    bytes_accessed = (Bp * IN_FEATURES * 4          # x read (f32)
                      + w1p.size * 2 + w2p.size * 2 # bf16 weights
                      + b1p.size * 4 + b2p.size * 4 # f32 biases
                      + Bp * CLASS_PAD * 2)         # bf16 output writeback

    out = pl.pallas_call(
        mnist_kernel,
        out_shape=jax.ShapeDtypeStruct((Bp, CLASS_PAD), jnp.bfloat16),
        grid=(Bp // TB,),
        in_specs=[
            pl.BlockSpec((TB, IN_FEATURES), lambda i: (i, 0)),        # x: batch-tiled
            pl.BlockSpec((IN_FEATURES, HIDDEN_PAD), lambda i: (0, 0)),  # W1: pinned
            pl.BlockSpec((1, HIDDEN_PAD), lambda i: (0, 0)),            # b1: pinned
            pl.BlockSpec((HIDDEN_PAD, CLASS_PAD), lambda i: (0, 0)),    # W2: pinned
            pl.BlockSpec((1, CLASS_PAD), lambda i: (0, 0)),             # b2: pinned
        ],
        out_specs=pl.BlockSpec((TB, CLASS_PAD), lambda i: (i, 0)),      # lane-dense out
        compiler_params=pltpu.CompilerParams(
            dimension_semantics=("parallel",)),
        cost_estimate=pl.CostEstimate(
            flops=flops,
            transcendentals=Bp * (CLASS_PAD + 1),
            bytes_accessed=bytes_accessed),
    )(x2d, w1p, b1p, w2p, b2p)

    # Strip batch / class padding; log-probs back to f32 for the caller.
    return out[:B, :NUM_CLASSES].astype(jnp.float32)


def init_params(key):
    """nn.Linear default init U(-1/sqrt(fan_in), +1/sqrt(fan_in)); stored as (in, out)."""
    k1, k2, k3, k4 = jax.random.split(key, 4)
    bound1 = 1.0 / jnp.sqrt(IN_FEATURES)
    bound2 = 1.0 / jnp.sqrt(HIDDEN)
    w1 = jax.random.uniform(k1, (IN_FEATURES, HIDDEN), jnp.float32, -bound1, bound1)
    b1 = jax.random.uniform(k2, (HIDDEN,), jnp.float32, -bound1, bound1)
    w2 = jax.random.uniform(k3, (HIDDEN, NUM_CLASSES), jnp.float32, -bound2, bound2)
    b2 = jax.random.uniform(k4, (NUM_CLASSES,), jnp.float32, -bound2, bound2)
    return w1, b1, w2, b2


if __name__ == "__main__":
    key = jax.random.PRNGKey(0)
    kx, kp = jax.random.split(key)

    B = 8
    x = jax.random.normal(kx, (B, 1, 28, 28), jnp.float32)      # NCHW, MNIST-shaped
    w1, b1, w2, b2 = init_params(kp)

    # One-time parameter prep (cast + lane-pad), reused across calls.
    w1p, b1p, w2p, b2p = prepare_params(w1, b1, w2, b2)

    log_probs = mnist_forward(x, w1p, b1p, w2p, b2p)
    log_probs = jax.block_until_ready(log_probs)

    # Reference in plain JAX with the same bf16 matmul inputs (f32 accumulate).
    x2d = x.reshape(B, -1).astype(jnp.bfloat16)
    h = jnp.dot(x2d, w1.astype(jnp.bfloat16),
                preferred_element_type=jnp.float32) + b1
    h = jnp.maximum(h, 0.0)
    ref_logits = jnp.dot(h.astype(jnp.bfloat16), w2.astype(jnp.bfloat16),
                         preferred_element_type=jnp.float32) + b2
    ref = jax.nn.log_softmax(ref_logits, axis=1)

    assert log_probs.shape == (B, NUM_CLASSES)
    # Kernel output is rounded to bf16 on store; tolerances account for that.
    assert jnp.allclose(log_probs, ref, atol=2e-2, rtol=2e-2)
    assert jnp.allclose(jnp.sum(jnp.exp(log_probs), axis=1), 1.0, atol=1e-2)

    print("KERNEL_OK")
</pallas_src>

<mosaic_0001>
module attributes {stable_mosaic.version = 11 : i64} {
  func.func @mnist_kernel(%arg0: i32, %arg1: memref<8x784xf32, #tpu.memory_space<vmem>>, %arg2: memref<784x128xbf16, #tpu.memory_space<vmem>>, %arg3: memref<1x128xf32, #tpu.memory_space<vmem>>, %arg4: memref<128x128xbf16, #tpu.memory_space<vmem>>, %arg5: memref<1x128xf32, #tpu.memory_space<vmem>>, %arg6: memref<8x128xbf16, #tpu.memory_space<vmem>>) attributes {dimension_semantics = [#tpu.dimension_semantics<parallel>], iteration_bounds = array<i64: 1>, scalar_prefetch = 0 : i64, scratch_operands = 0 : i64, tpu.core_type = #tpu.core_type<tc>, window_params = [{transform_indices = @transform_0, window_bounds = array<i64: 8, 784>}, {pipeline_mode = #tpu.pipeline_mode<synchronous>, transform_indices = @transform_1, window_bounds = array<i64: 784, 128>}, {pipeline_mode = #tpu.pipeline_mode<synchronous>, transform_indices = @transform_2, window_bounds = array<i64: 1, 128>}, {pipeline_mode = #tpu.pipeline_mode<synchronous>, transform_indices = @transform_3, window_bounds = array<i64: 128, 128>}, {pipeline_mode = #tpu.pipeline_mode<synchronous>, transform_indices = @transform_4, window_bounds = array<i64: 1, 128>}, {transform_indices = @transform_5, window_bounds = array<i64: 8, 128>}]} {
    %c0 = arith.constant 0 : index
    %c0_0 = arith.constant 0 : index
    %0 = vector.load %arg1[%c0, %c0_0] : memref<8x784xf32, #tpu.memory_space<vmem>>, vector<8x784xf32>
    %1 = arith.truncf %0 : vector<8x784xf32> to vector<8x784xbf16>
    %c0_1 = arith.constant 0 : index
    %c0_2 = arith.constant 0 : index
    %2 = vector.load %arg2[%c0_1, %c0_2] : memref<784x128xbf16, #tpu.memory_space<vmem>>, vector<784x128xbf16>
    %cst = arith.constant dense<0.000000e+00> : vector<8x128xf32>
    %3 = tpu.matmul %1, %2, %cst {dimension_numbers = #tpu.dot_dimension_numbers<[1], [0], [0], [1], [0, 0, 1, 1], [], []>} : vector<8x784xbf16>, vector<784x128xbf16>, vector<8x128xf32> -> vector<8x128xf32>
    %c0_3 = arith.constant 0 : index
    %c0_4 = arith.constant 0 : index
    %4 = vector.load %arg3[%c0_3, %c0_4] : memref<1x128xf32, #tpu.memory_space<vmem>>, vector<1x128xf32>
    %5 = vector.broadcast %4 : vector<1x128xf32> to vector<8x128xf32>
    %6 = arith.addf %3, %5 : vector<8x128xf32>
    %cst_5 = arith.constant 0.000000e+00 : f32
    %7 = vector.broadcast %cst_5 : f32 to vector<8x128xf32>
    %8 = arith.maximumf %6, %7 : vector<8x128xf32>
    %9 = arith.truncf %8 : vector<8x128xf32> to vector<8x128xbf16>
    %c0_6 = arith.constant 0 : index
    %c0_7 = arith.constant 0 : index
    %10 = vector.load %arg4[%c0_6, %c0_7] : memref<128x128xbf16, #tpu.memory_space<vmem>>, vector<128x128xbf16>
    %cst_8 = arith.constant dense<0.000000e+00> : vector<8x128xf32>
    %11 = tpu.matmul %9, %10, %cst_8 {dimension_numbers = #tpu.dot_dimension_numbers<[1], [0], [0], [1], [0, 0, 1, 1], [], []>} : vector<8x128xbf16>, vector<128x128xbf16>, vector<8x128xf32> -> vector<8x128xf32>
    %c0_9 = arith.constant 0 : index
    %c0_10 = arith.constant 0 : index
    %12 = vector.load %arg5[%c0_9, %c0_10] : memref<1x128xf32, #tpu.memory_space<vmem>>, vector<1x128xf32>
    %13 = vector.broadcast %12 : vector<1x128xf32> to vector<8x128xf32>
    %14 = arith.addf %11, %13 : vector<8x128xf32>
    %cst_11 = arith.constant dense<0xFF800000> : vector<8xf32>
    %15 = vector.multi_reduction <maximumf>, %14, %cst_11 [1] : vector<8x128xf32> to vector<8xf32>
    %16 = vector.shape_cast %15 : vector<8xf32> to vector<8x1xf32>
    %17 = vector.broadcast %16 : vector<8x1xf32> to vector<8x128xf32>
    %18 = arith.subf %14, %17 : vector<8x128xf32>
    %19 = math.exp %18 : vector<8x128xf32>
    %cst_12 = arith.constant dense<0.000000e+00> : vector<8xf32>
    %20 = vector.multi_reduction <add>, %19, %cst_12 [1] : vector<8x128xf32> to vector<8xf32>
    %21 = vector.shape_cast %20 : vector<8xf32> to vector<8x1xf32>
    %22 = math.log %21 : vector<8x1xf32>
    %23 = vector.broadcast %22 : vector<8x1xf32> to vector<8x128xf32>
    %24 = arith.subf %18, %23 : vector<8x128xf32>
    %25 = arith.truncf %24 : vector<8x128xf32> to vector<8x128xbf16>
    %c0_13 = arith.constant 0 : index
    %c0_14 = arith.constant 0 : index
    %26 = vector.load %arg6[%c0_13, %c0_14] : memref<8x128xbf16, #tpu.memory_space<vmem>>, vector<8x128xbf16>
    tpu.vector_store %arg6[%c0_13, %c0_14], %25 {strides = array<i32>} : memref<8x128xbf16, #tpu.memory_space<vmem>>, vector<8x128xbf16>,
    return
  }
  func.func @transform_0(%arg0: i32) -> (i32, i32) {
    %c0_i32 = arith.constant 0 : i32
    %c0_i32_0 = arith.constant 0 : i32
    return %arg0, %c0_i32 : i32, i32
  }
  func.func @transform_1(%arg0: i32) -> (i32, i32) {
    %c0_i32 = arith.constant 0 : i32
    %c0_i32_0 = arith.constant 0 : i32
    %c0_i32_1 = arith.constant 0 : i32
    return %c0_i32, %c0_i32_0 : i32, i32
  }
  func.func @transform_2(%arg0: i32) -> (i32, i32) {
    %c0_i32 = arith.constant 0 : i32
    %c0_i32_0 = arith.constant 0 : i32
    %c0_i32_1 = arith.constant 0 : i32
    return %c0_i32, %c0_i32_0 : i32, i32
  }
  func.func @transform_3(%arg0: i32) -> (i32, i32) {
    %c0_i32 = arith.constant 0 : i32
    %c0_i32_0 = arith.constant 0 : i32
    %c0_i32_1 = arith.constant 0 : i32
    return %c0_i32, %c0_i32_0 : i32, i32
  }
  func.func @transform_4(%arg0: i32) -> (i32, i32) {
    %c0_i32 = arith.constant 0 : i32
    %c0_i32_0 = arith.constant 0 : i32
    %c0_i32_1 = arith.constant 0 : i32
    return %c0_i32, %c0_i32_0 : i32, i32
  }
  func.func @transform_5(%arg0: i32) -> (i32, i32) {
    %c0_i32 = arith.constant 0 : i32
    %c0_i32_0 = arith.constant 0 : i32
    return %arg0, %c0_i32 : i32, i32
  }
}

</mosaic_0001>

<bundles_post_ra>
// kernel: mnist_forward.1
= control target key start
LH: loop header
LB: loop body
LE: loop exit
PB: predicated region body
PF: predicated region fallthrough
CT: control target
= control target key end

     0   :  { %vm431_vm0 = vcmask 130048   ;;  %s1148_s1 = inlined_call_operand.vmem [shape: bf16[784,128], index: 1, kind: input, shape index: {}]   ;;  %s1149_s2 = inlined_call_operand.vmem [shape: f32[1,128], index: 2, kind: input, shape index: {}]   ;;  %s1150_s0 = inlined_call_operand.vmem [shape: f32[8,784], index: 0, kind: input, shape index: {}]   ;;  %s1151_s4 = inlined_call_operand.vmem [shape: f32[1,128], index: 4, kind: input, shape index: {}]   ;;  %s1152_s3 = inlined_call_operand.vmem [shape: bf16[128,128], index: 3, kind: input, shape index: {}]   ;;  %s1153_s5 = inlined_call_operand.vmem [shape: bf16[8,128], index: 5, kind: output, shape index: {}]  }
   0x1   :  { %v861_v0 = vld [vmem:[%s1148_s1 + $0x38] sm:$0xff]  ;;  %v860_v3 = vld [vmem:[%s1148_s1 + $0x30] sm:$0xff]  ;;  %v859_v8 = vld [vmem:[%s1148_s1 + $0x28] sm:$0xff] }
   0x2   :  { %v869_v1 = vld [vmem:[%s1148_s1 + $0x78] sm:$0xff]  ;;  %435 = vmatpush.bf16.msra.mxu0 %v861_v0  ;;  %v868_v4 = vld [vmem:[%s1148_s1 + $0x70] sm:$0xff]  ;;  %v867_v9 = vld [vmem:[%s1148_s1 + $0x68] sm:$0xff] }
   0x3   :  { %v877_v2 = vld [vmem:[%s1148_s1 + $0xb8] sm:$0xff]  ;;  %448 = vmatpush.bf16.msra.mxu1 %v869_v1  ;;  %v876_v5 = vld [vmem:[%s1148_s1 + $0xb0] sm:$0xff]  ;;  %v875_v10 = vld [vmem:[%s1148_s1 + $0xa8] sm:$0xff] }
   0x4   :  { %461 = vmatpush.bf16.msra.mxu2 %v877_v2  ;;  %v885_v6 = vld [vmem:[%s1148_s1 + $0xf8] sm:$0xff]  ;;  %v884_v7 = vld [vmem:[%s1148_s1 + $0xf0] sm:$0xff]  ;;  %v883_v11 = vld [vmem:[%s1148_s1 + $0xe8] sm:$0xff] }
   0x5   :  { %474 = vmatpush.bf16.msra.mxu3 %v885_v6  ;;  %v858_v12 = vld [vmem:[%s1148_s1 + $0x20] sm:$0xff]  ;;  %v857_v16 = vld [vmem:[%s1148_s1 + $0x18] sm:$0xff]  ;;  %v856_v20 = vld [vmem:[%s1148_s1 + $0x10] sm:$0xff] }
   0x6   :  { %436 = vmatpush.bf16.msra.mxu0 %v860_v3  ;;  %v866_v13 = vld [vmem:[%s1148_s1 + $0x60] sm:$0xff]  ;;  %v865_v17 = vld [vmem:[%s1148_s1 + $0x58] sm:$0xff]  ;;  %v864_v21 = vld [vmem:[%s1148_s1 + $0x50] sm:$0xff] }
   0x7   :  { %449 = vmatpush.bf16.msra.mxu1 %v868_v4  ;;  %v874_v14 = vld [vmem:[%s1148_s1 + $0xa0] sm:$0xff]  ;;  %v873_v18 = vld [vmem:[%s1148_s1 + $0x98] sm:$0xff]  ;;  %v872_v22 = vld [vmem:[%s1148_s1 + $0x90] sm:$0xff] }
   0x8   :  { %462 = vmatpush.bf16.msra.mxu2 %v876_v5  ;;  %v882_v15 = vld [vmem:[%s1148_s1 + $0xe0] sm:$0xff]  ;;  %v881_v19 = vld [vmem:[%s1148_s1 + $0xd8] sm:$0xff]  ;;  %v880_v23 = vld [vmem:[%s1148_s1 + $0xd0] sm:$0xff] }
   0x9   :  { %475 = vmatpush.bf16.msra.mxu3 %v884_v7  ;;  %v855_v24 = vld [vmem:[%s1148_s1 + $0x8] sm:$0xff]  ;;  %v854_v27 = vld [vmem:[%s1148_s1] sm:$0xff]  ;;  %v893_v32 = vld [vmem:[%s1148_s1 + $0x138] sm:$0xff] }
   0xa   :  { %437 = vmatpush.bf16.msra.mxu0 %v859_v8  ;;  %v863_v25 = vld [vmem:[%s1148_s1 + $0x48] sm:$0xff]  ;;  %v862_v29 = vld [vmem:[%s1148_s1 + $0x40] sm:$0xff]  ;;  %v901_v33 = vld [vmem:[%s1148_s1 + $0x178] sm:$0xff] }
   0xb   :  { %450 = vmatpush.bf16.msra.mxu1 %v867_v9  ;;  %v871_v26 = vld [vmem:[%s1148_s1 + $0x88] sm:$0xff]  ;;  %v21_v30 = vld [vmem:[%s1150_s0] sm:$0xff]  ;;  %v23_v35 = vld [vmem:[%s1150_s0 + $0x10] sm:$0xff] }
   0xc   :  { %463 = vmatpush.bf16.msra.mxu2 %v875_v10  ;;  %v879_v28 = vld [vmem:[%s1148_s1 + $0xc8] sm:$0xff]  ;;  %v870_v34 = vld [vmem:[%s1148_s1 + $0x80] sm:$0xff]  ;;  %v28_v36 = vpack.c.bf16 %v21_v30, %v21_v30  ;;  %v24_v40 = vld [vmem:[%s1150_s0 + $0x18] sm:$0xff]  ;;  %v30_v43 = vpack.c.bf16 %v23_v35, %v23_v35 }
   0xd   :  { %476 = vmatpush.bf16.msra.mxu3 %v883_v11  ;;  %v22_v31 = vld [vmem:[%s1150_s0 + $0x8] sm:$0xff]  ;;  %v878_v38 = vld [vmem:[%s1148_s1 + $0xc0] sm:$0xff]  ;;  %v892_v41 = vld [vmem:[%s1148_s1 + $0x130] sm:$0xff]  ;;  %v31_v44 = vpack.c.bf16 %v24_v40, %v24_v40 }
   0xe   :  { %438 = vmatpush.bf16.msra.mxu0 %v858_v12  ;;  %v29_v37 = vpack.c.bf16 %v22_v31, %v22_v31  ;;  %v902_v39 = vld [vmem:[%s1148_s1 + $0x180] sm:$0xff]  ;;  %v900_v42 = vld [vmem:[%s1148_s1 + $0x170] sm:$0xff]  ;;  %v891_v45 = vld [vmem:[%s1148_s1 + $0x128] sm:$0xff] }
   0xf   :  { %451 = vmatpush.bf16.msra.mxu1 %v866_v13  ;;  %v899_v46 = vld [vmem:[%s1148_s1 + $0x168] sm:$0xff]  ;;  %v890_v47 = vld [vmem:[%s1148_s1 + $0x120] sm:$0xff]  ;;  %v889_v49 = vld [vmem:[%s1148_s1 + $0x118] sm:$0xff] }
  0x10   :  { %464 = vmatpush.bf16.msra.mxu2 %v874_v14  ;;  %v898_v48 = vld [vmem:[%s1148_s1 + $0x160] sm:$0xff]  ;;  %v897_v50 = vld [vmem:[%s1148_s1 + $0x158] sm:$0xff]  ;;  %v27_v51 = vld [vmem:[%s1150_s0 + $0x30] sm:$0xff] }
  0x11   :  { %477 = vmatpush.bf16.msra.mxu3 %v882_v15  ;;  %v888_v52 = vld [vmem:[%s1148_s1 + $0x110] sm:$0xff]  ;;  %v34_v54 = vpack.c.bf16 %v27_v51, %v27_v51  ;;  %v887_v55 = vld [vmem:[%s1148_s1 + $0x108] sm:$0xff]  ;;  %v886_v57 = vld [vmem:[%s1148_s1 + $0x100] sm:$0xff] }
  0x12   :  { %439 = vmatpush.bf16.msra.mxu0 %v857_v16  ;;  %v896_v53 = vld [vmem:[%s1148_s1 + $0x150] sm:$0xff]  ;;  %v895_v56 = vld [vmem:[%s1148_s1 + $0x148] sm:$0xff]  ;;  %v894_v58 = vld [vmem:[%s1148_s1 + $0x140] sm:$0xff] }
  0x13   :  { %452 = vmatpush.bf16.msra.mxu1 %v865_v17  ;;  %v25_v59 = vld [vmem:[%s1150_s0 + $0x20] sm:$0xff]  ;;  %v26_v60 = vld [vmem:[%s1150_s0 + $0x28] sm:$0xff]  ;;  %v910_v63 = vld [vmem:[%s1152_s3 + $0x38] sm:$0xff] }
  0x14   :  { %465 = vmatpush.bf16.msra.mxu2 %v873_v18  ;;  %v32_v61 = vpack.c.bf16 %v25_v59, %v25_v59  ;;  %v33_v62 = vpack.c.bf16 %v26_v60, %v26_v60  ;;  %v909_v0 = vld [vmem:[%s1152_s3 + $0x30] sm:$0xff]  ;;  %v908_v1 = vld [vmem:[%s1152_s3 + $0x28] sm:$0xff]  ;;  %v907_v2 = vld [vmem:[%s1152_s3 + $0x20] sm:$0xff] }
  0x15   :  { %478 = vmatpush.bf16.msra.mxu3 %v881_v19  ;;  %v906_v3 = vld [vmem:[%s1152_s3 + $0x18] sm:$0xff]  ;;  %v905_v4 = vld [vmem:[%s1152_s3 + $0x10] sm:$0xff]  ;;  %v904_v5 = vld [vmem:[%s1152_s3 + $0x8] sm:$0xff] }
  0x16   :  { %440 = vmatpush.bf16.msra.mxu0 %v856_v20  ;;  %v903_v8 = vld [vmem:[%s1152_s3] sm:$0xff] }
  0x17   :  { %453 = vmatpush.bf16.msra.mxu1 %v864_v21  ;;  %v911_v13 = vld [vmem:[%s1149_s2] ss:$0 sm:$0xff] }
  0x18   :  { %466 = vmatpush.bf16.msra.mxu2 %v872_v22  ;;  %v912_v31 = vld [vmem:[%s1151_s4] ss:$0 sm:$0xff] }
  0x19   :  { %479 = vmatpush.bf16.msra.mxu3 %v880_v23 }
  0x1a   :  { %441 = vmatpush.bf16.msra.mxu0 %v855_v24 }
  0x1b   :  { %454 = vmatpush.bf16.msra.mxu1 %v863_v25 }
  0x1c   :  { %467 = vmatpush.bf16.msra.mxu2 %v871_v26 }
  0x1d   :  { %480 = vmatpush.bf16.msra.mxu3 %v879_v28 }
  0x1e   :  { %442 = vmatpush.bf16.msra.mxu0 %v854_v27 }
  0x1f   :  { %455 = vmatpush.bf16.msra.mxu1 %v862_v29 }
  0x20   :  { %468 = vmatpush.bf16.msra.mxu2 %v870_v34 }
  0x21   :  { %443 = vmatmul.bf16.vlgmr.msra.gmra.mxu0 %v28_v36  ;;  %481 = vmatpush.bf16.msra.mxu3 %v878_v38 }
  0x22   :  { %487 = vmatpush.bf16.msrb.mxu0 %v893_v32  ;;  %456 = vmatmul.bf16.vlgmr.msra.gmra.mxu1 %v29_v37 }
  0x23   :  { %500 = vmatpush.bf16.msrb.mxu1 %v901_v33  ;;  %469 = vmatmul.bf16.vlgmr.msra.gmra.mxu2 %v30_v43 }
  0x24   :  { %520 = vmatpush.bf16.msrb.mxu2 %v902_v39  ;;  %482 = vmatmul.bf16.vlgmr.msra.gmra.mxu3 %v31_v44 }
  0x25   :  { %596 = vmatpush.bf16.msrb.mxu3 %v910_v63 }
  0x26   :  { %488 = vmatpush.bf16.msrb.mxu0 %v892_v41 }
  0x27   :  { %501 = vmatpush.bf16.msrb.mxu1 %v900_v42 }
  0x29   :  { %597 = vmatpush.bf16.msrb.mxu3 %v909_v0 }
  0x2a   :  { %489 = vmatpush.bf16.msrb.mxu0 %v891_v45 }
  0x2b   :  { %502 = vmatpush.bf16.msrb.mxu1 %v899_v46 }
  0x2d   :  { %598 = vmatpush.bf16.msrb.mxu3 %v908_v1 }
  0x2e   :  { %490 = vmatpush.bf16.msrb.mxu0 %v890_v47 }
  0x2f   :  { %503 = vmatpush.bf16.msrb.mxu1 %v898_v48 }
  0x31   :  { %599 = vmatpush.bf16.msrb.mxu3 %v907_v2 }
  0x32   :  { %491 = vmatpush.bf16.msrb.mxu0 %v889_v49 }
  0x33   :  { %504 = vmatpush.bf16.msrb.mxu1 %v897_v50  ;;  %821 = vmatmul.msk.bf16.vlgmr.msrb.gmra.mxu2 %vm431_vm0, %v34_v54 }
  0x35   :  { %600 = vmatpush.bf16.msrb.mxu3 %v906_v3 }
  0x36   :  { %492 = vmatpush.bf16.msrb.mxu0 %v888_v52 }
  0x37   :  { %505 = vmatpush.bf16.msrb.mxu1 %v896_v53 }
  0x39   :  { %601 = vmatpush.bf16.msrb.mxu3 %v905_v4 }
  0x3a   :  { %493 = vmatpush.bf16.msrb.mxu0 %v887_v55 }
  0x3b   :  { %506 = vmatpush.bf16.msrb.mxu1 %v895_v56 }
  0x3d   :  { %602 = vmatpush.bf16.msrb.mxu3 %v904_v5 }
  0x3e   :  { %494 = vmatpush.bf16.msrb.mxu0 %v886_v57 }
  0x3f   :  { %507 = vmatpush.bf16.msrb.mxu1 %v894_v58 }
  0x41   :  { %495 = vmatmul.bf16.vlgmr.msrb.gmra.mxu0 %v32_v61  ;;  %603 = vmatpush.bf16.msrb.mxu3 %v903_v8 }
  0x42   :  { %508 = vmatmul.bf16.vlgmr.msrb.gmra.mxu1 %v33_v62 }
  0x9e   :  { %v444_v6 = vpop.f32.mrf.mxu0 }
  0x9f   :  { %v457_v7 = vpop.f32.mrf.mxu1  ;;  %v445_v14 = vadd.f32 %v911_v13, %v444_v6 }
  0xa1   :  { %v458_v17 = vadd.f32 %v457_v7, %v445_v14 }
  0xa6   :  { %v446_v9 = vpop.f32.mrf.mxu0  ;;  %v470_v11 = vpop.f32.mrf.mxu2 }
  0xa7   :  { %v459_v10 = vpop.f32.mrf.mxu1  ;;  %v483_v12 = vpop.f32.mrf.mxu3  ;;  %v471_v18 = vadd.f32 %v470_v11, %v458_v17 }
  0xa9   :  { %v484_v20 = vadd.f32 %v483_v12, %v471_v18 }
  0xae   :  { %v472_v15 = vpop.f32.mrf.mxu2 }
  0xaf   :  { %v485_v16 = vpop.f32.mrf.mxu3 }
  0xb6   :  { %v522_v19 = vpop.f32.mrf.mxu2 }
  0xbe   :  { %v496_v21 = vpop.f32.mrf.mxu0  ;;  %v524_v25 = vpop.f32.mrf.mxu2 }
  0xbf   :  { %v509_v22 = vpop.f32.mrf.mxu1  ;;  %v497_v23 = vadd.f32 %v496_v21, %v484_v20 }
  0xc1   :  { %v510_v24 = vadd.f32 %v509_v22, %v497_v23 }
  0xc3   :  { %v523_v26 = vadd.f32 %v522_v19, %v510_v24 }
  0xc5   :  { %v526_v27 = vmax.f32 %v523_v26, 0.0 }
  0xc6   :  { %v498_v28 = vpop.f32.mrf.mxu0 }
  0xc7   :  { %v511_v29 = vpop.f32.mrf.mxu1  ;;  %v527_v30 = vpack.c.bf16 %v526_v27, %v526_v27 }
  0xc9   :  { %604 = vmatmul.bf16.vlgmr.msrb.gmra.mxu3 %v527_v30 }
 0x14c   :  { %v605_v32 = vpop.f32.mrf.mxu3 }
 0x14d   :  { %v606_v33 = vadd.f32 %v912_v31, %v605_v32 }
 0x14f   :  { %609 = vmax.xlane.f32.xlu0 %v606_v33 }
 0x154   :  { %v607_v34 = vpop.f32.mrf.mxu3 }
 0x1c2   :  { %v610_v35 = vpop.xlane.xlu0 %609 }
 0x1c3   :  { %v611_v36 = vsub.f32 %v606_v33, %v610_v35 }
 0x1c5   :  { %v612_v37 = vmul.f32 1.442695, %v611_v36 }
 0x1c7   :  { %913 = vpow2.f32 %v612_v37 }
 0x1cd   :  { %v914_v38 = vpop.eup %913 }
 0x1ce   :  { %614 = vadd.xlane.f32.xlu0 %v914_v38 }
 0x241   :  { %v615_v39 = vpop.xlane.xlu0 %614 }
 0x242   :  { %915 = vlog2.f32 %v615_v39 }
 0x248   :  { %v916_v40 = vpop.eup %915 }
 0x249   :  { %v617_v41 = vmul.f32 0.6931472, %v916_v40 }
 0x24b   :  { %v618_v42 = vsub.f32 %v611_v36, %v617_v41 }
 0x24d   :  { %v619_v43 = vpack.c.bf16 %v618_v42, %v618_v42 }
 0x24f   :  { %620 = vst [vmem:[%s1153_s5] sm:$0xf] %v619_v43 }

</bundles_post_ra>
